<compile_context>
chip_gen: v7x
topology: tpu7x:2x2x1
jax: 0.10.0
libtpu: 0.0.40
codegen_flags: <defaults>
</compile_context>

<pallas_src>
import functools

import jax
import jax.numpy as jnp
from jax import lax
from jax.experimental import pallas as pl
from jax.experimental.pallas import tpu as pltpu


def _gather_kernel(idx_ref, x_ref, o_ref, acc_ref, *, n_total, mask_tail):
    """One-hot MXU gather of the kept rows for one (batch, n-chunk) step.

    idx_ref : VMEM (1, K, 1) int32  -- keep indices for this batch element
    x_ref   : VMEM (1, Nc, D)       -- current N-chunk of the token slab
    o_ref   : VMEM (1, K, D)        -- gathered tokens (resident across chunks)
    acc_ref : VMEM (K, D) f32       -- accumulator scratch
    """
    c = pl.program_id(1)

    @pl.when(c == 0)
    def _():
        acc_ref[...] = jnp.zeros_like(acc_ref)

    k_keep = idx_ref.shape[1]
    n_chunk = x_ref.shape[1]
    start = c * n_chunk

    # one_hot[k, j] = (keep_idx[k] == start + j); built on the VPU, no transpose
    # needed because idx is already sublane-oriented (K, 1).
    idx = idx_ref[0]                                             # (K, 1) int32
    cols = lax.broadcasted_iota(jnp.int32, (k_keep, n_chunk), 1)
    one_hot = ((idx - start) == cols).astype(x_ref.dtype)        # (K, Nc)

    x_blk = x_ref[0]                                             # (Nc, D)
    if mask_tail:
        # Last chunk may extend past n; zero the padded rows so stale VMEM
        # (possibly NaN) never reaches the MXU accumulator.
        valid = (start + lax.broadcasted_iota(jnp.int32, (n_chunk, 1), 0)) < n_total
        x_blk = jnp.where(valid, x_blk, jnp.zeros_like(x_blk))

    acc_ref[...] += jnp.dot(one_hot, x_blk, preferred_element_type=jnp.float32)

    @pl.when(c == pl.num_programs(1) - 1)
    def _():
        o_ref[0] = acc_ref[...].astype(o_ref.dtype)


def _pick_n_chunk(n, d, itemsize, budget_bytes=8 << 20):
    """Largest N-chunk whose double-buffered input block fits the budget."""
    max_rows = max(8, budget_bytes // (2 * d * itemsize))
    if n <= max_rows:
        return n
    return max(8, (max_rows // 8) * 8)   # second-to-last block dim: multiple of 8


def patch_dropout(x, key, prob, training=True):
    """JAX/Pallas equivalent of PatchDropout.forward."""
    assert 0.0 <= prob < 1.0
    if not training or prob == 0.0:
        return x

    b, n, d = x.shape
    num_keep = max(1, int(n * (1.0 - prob)))

    # Index selection (randn + top_k) is cheap glue; keep it in plain JAX.
    # TODO(synk): uses JAX's PRNG, not torch.randn, so the concrete kept indices
    # differ from PyTorch while the semantics/distribution match.
    scores = jax.random.normal(key, (b, n), dtype=jnp.float32)
    _, keep_idx = lax.top_k(scores, num_keep)                     # (b, K)
    keep_idx = keep_idx.astype(jnp.int32)[..., None]              # (b, K, 1)

    itemsize = x.dtype.itemsize
    n_chunk = _pick_n_chunk(n, d, itemsize)
    n_steps = pl.cdiv(n, n_chunk)
    mask_tail = (n % n_chunk) != 0

    kernel = functools.partial(_gather_kernel, n_total=n, mask_tail=mask_tail)

    grid_spec = pltpu.PrefetchScalarGridSpec(
        num_scalar_prefetch=0,
        grid=(b, n_steps),
        in_specs=[
            pl.BlockSpec((1, num_keep, 1), lambda i, c: (i, 0, 0)),   # keep_idx
            pl.BlockSpec((1, n_chunk, d), lambda i, c: (i, c, 0)),    # x slab
        ],
        out_specs=pl.BlockSpec((1, num_keep, d), lambda i, c: (i, 0, 0)),
        scratch_shapes=[pltpu.VMEM((num_keep, d), jnp.float32)],
    )

    # Right-size VMEM: double-buffered in/out blocks + accumulator + headroom.
    vmem_bytes = (2 * n_chunk * d * itemsize          # x blocks
                  + 2 * num_keep * d * itemsize       # output blocks
                  + 2 * num_keep * 4                  # index blocks
                  + num_keep * d * 4)                 # f32 accumulator
    vmem_limit = min(max(int(1.5 * vmem_bytes) + (4 << 20), 16 << 20), 64 << 20)

    return pl.pallas_call(
        kernel,
        grid_spec=grid_spec,
        out_shape=jax.ShapeDtypeStruct((b, num_keep, d), x.dtype),
        compiler_params=pltpu.CompilerParams(
            dimension_semantics=("parallel", "arbitrary"),
            vmem_limit_bytes=vmem_limit,
        ),
    )(keep_idx, x)


if __name__ == "__main__":
    key = jax.random.PRNGKey(0)
    k_x, k_drop = jax.random.split(key)

    # Small but lane-dense shapes (D multiple of 128 -> unmasked output stores).
    B, N, D = 2, 16, 128
    prob = 0.5

    x = jax.random.normal(k_x, (B, N, D), dtype=jnp.float32)

    out = jax.block_until_ready(patch_dropout(x, k_drop, prob, training=True))

    # Reference check: same indices, plain-JAX gather.
    num_keep = max(1, int(N * (1.0 - prob)))
    scores = jax.random.normal(k_drop, (B, N), dtype=jnp.float32)
    _, keep_idx = lax.top_k(scores, num_keep)
    ref = jnp.take_along_axis(x, keep_idx[..., None], axis=1)

    assert out.shape == (B, num_keep, D)
    assert jnp.allclose(out, ref), "Pallas gather mismatch vs reference"

    # Eval mode / prob == 0 path returns x unchanged.
    assert jnp.array_equal(patch_dropout(x, k_drop, prob, training=False), x)

    print("KERNEL_OK")
</pallas_src>

<mosaic_0001>
module attributes {stable_mosaic.version = 11 : i64} {
  func.func @_gather_kernel(%arg0: i32, %arg1: i32, %arg2: memref<1x8x1xi32, #tpu.memory_space<vmem>>, %arg3: memref<1x16x128xf32, #tpu.memory_space<vmem>>, %arg4: memref<1x8x128xf32, #tpu.memory_space<vmem>>, %arg5: memref<8x128xf32, #tpu.memory_space<vmem>>) attributes {dimension_semantics = [#tpu.dimension_semantics<parallel>, #tpu.dimension_semantics<arbitrary>], iteration_bounds = array<i64: 2, 1>, scalar_prefetch = 0 : i64, scratch_operands = 1 : i64, tpu.core_type = #tpu.core_type<tc>, window_params = [{transform_indices = @transform_0, window_bounds = array<i64: 1, 8, 1>}, {transform_indices = @transform_1, window_bounds = array<i64: 1, 16, 128>}, {transform_indices = @transform_2, window_bounds = array<i64: 1, 8, 128>}]} {
    %c0_i32 = arith.constant 0 : i32
    %0 = arith.cmpi eq, %arg1, %c0_i32 : i32
    %1 = arith.extui %0 : i1 to i32
    %c0_i32_0 = arith.constant 0 : i32
    %2 = arith.cmpi ne, %1, %c0_i32_0 : i32
    scf.if %2 {
      %cst_12 = arith.constant 0.000000e+00 : f32
      %22 = vector.broadcast %cst_12 : f32 to vector<8x128xf32>
      %c0_13 = arith.constant 0 : index
      %c0_14 = arith.constant 0 : index
      %23 = vector.load %arg5[%c0_13, %c0_14] : memref<8x128xf32, #tpu.memory_space<vmem>>, vector<8x128xf32>
      tpu.vector_store %arg5[%c0_13, %c0_14], %22 {strides = array<i32>} : memref<8x128xf32, #tpu.memory_space<vmem>>, vector<8x128xf32>,
    } else {
    }
    %c16_i32 = arith.constant 16 : i32
    %3 = arith.muli %arg1, %c16_i32 : i32
    %c0 = arith.constant 0 : index
    %c0_1 = arith.constant 0 : index
    %c0_2 = arith.constant 0 : index
    %4 = vector.load %arg2[%c0, %c0_1, %c0_2] : memref<1x8x1xi32, #tpu.memory_space<vmem>>, vector<1x8x1xi32>
    %5 = vector.shape_cast %4 : vector<1x8x1xi32> to vector<8x1xi32>
    %6 = tpu.iota {dimensions = array<i32: 1>} : vector<8x16xi32>
    %7 = vector.broadcast %3 : i32 to vector<8x1xi32>
    %8 = arith.subi %5, %7 : vector<8x1xi32>
    %9 = vector.broadcast %8 : vector<8x1xi32> to vector<8x16xi32>
    %10 = arith.cmpi eq, %9, %6 : vector<8x16xi32>
    %11 = arith.extui %10 : vector<8x16xi1> to vector<8x16xi32>
    %12 = arith.sitofp %11 : vector<8x16xi32> to vector<8x16xf32>
    %c0_3 = arith.constant 0 : index
    %c0_4 = arith.constant 0 : index
    %c0_5 = arith.constant 0 : index
    %13 = vector.load %arg3[%c0_3, %c0_4, %c0_5] : memref<1x16x128xf32, #tpu.memory_space<vmem>>, vector<1x16x128xf32>
    %14 = vector.shape_cast %13 : vector<1x16x128xf32> to vector<16x128xf32>
    %c0_6 = arith.constant 0 : index
    %c0_7 = arith.constant 0 : index
    %15 = vector.load %arg5[%c0_6, %c0_7] : memref<8x128xf32, #tpu.memory_space<vmem>>, vector<8x128xf32>
    %cst = arith.constant dense<0.000000e+00> : vector<8x128xf32>
    %16 = tpu.matmul %12, %14, %cst {dimension_numbers = #tpu.dot_dimension_numbers<[1], [0], [0], [1], [0, 0, 1, 1], [], []>} : vector<8x16xf32>, vector<16x128xf32>, vector<8x128xf32> -> vector<8x128xf32>
    %17 = arith.addf %15, %16 : vector<8x128xf32>
    %c0_8 = arith.constant 0 : index
    %c0_9 = arith.constant 0 : index
    %18 = vector.load %arg5[%c0_8, %c0_9] : memref<8x128xf32, #tpu.memory_space<vmem>>, vector<8x128xf32>
    tpu.vector_store %arg5[%c0_8, %c0_9], %17 {strides = array<i32>} : memref<8x128xf32, #tpu.memory_space<vmem>>, vector<8x128xf32>,
    %c0_i32_10 = arith.constant 0 : i32
    %19 = arith.cmpi eq, %arg1, %c0_i32_10 : i32
    %20 = arith.extui %19 : i1 to i32
    %c0_i32_11 = arith.constant 0 : i32
    %21 = arith.cmpi ne, %20, %c0_i32_11 : i32
    scf.if %21 {
      %c0_12 = arith.constant 0 : index
      %c0_13 = arith.constant 0 : index
      %22 = vector.load %arg5[%c0_12, %c0_13] : memref<8x128xf32, #tpu.memory_space<vmem>>, vector<8x128xf32>
      %c0_14 = arith.constant 0 : index
      %c0_15 = arith.constant 0 : index
      %c0_16 = arith.constant 0 : index
      %23 = vector.load %arg4[%c0_14, %c0_15, %c0_16] : memref<1x8x128xf32, #tpu.memory_space<vmem>>, vector<1x8x128xf32>
      %24 = vector.shape_cast %23 : vector<1x8x128xf32> to vector<8x128xf32>
      %25 = vector.shape_cast %22 : vector<8x128xf32> to vector<1x8x128xf32>
      tpu.vector_store %arg4[%c0_14, %c0_15, %c0_16], %25 {strides = array<i32>} : memref<1x8x128xf32, #tpu.memory_space<vmem>>, vector<1x8x128xf32>,
    } else {
    }
    return
  }
  func.func @transform_0(%arg0: i32, %arg1: i32) -> (i32, i32, i32) {
    %c0_i32 = arith.constant 0 : i32
    %c0_i32_0 = arith.constant 0 : i32
    %c0_i32_1 = arith.constant 0 : i32
    return %arg0, %c0_i32, %c0_i32_0 : i32, i32, i32
  }
  func.func @transform_1(%arg0: i32, %arg1: i32) -> (i32, i32, i32) {
    %c0_i32 = arith.constant 0 : i32
    %c0_i32_0 = arith.constant 0 : i32
    return %arg0, %arg1, %c0_i32 : i32, i32, i32
  }
  func.func @transform_2(%arg0: i32, %arg1: i32) -> (i32, i32, i32) {
    %c0_i32 = arith.constant 0 : i32
    %c0_i32_0 = arith.constant 0 : i32
    %c0_i32_1 = arith.constant 0 : i32
    return %arg0, %c0_i32, %c0_i32_0 : i32, i32, i32
  }
}

</mosaic_0001>

<bundles_post_ra>
// kernel: tpu_custom_call.1
= control target key start
LH: loop header
LB: loop body
LE: loop exit
PB: predicated region body
PF: predicated region fallthrough
CT: control target
= control target key end

     0   :  { %7 = vsyncpa [#allocation4], 0  ;;  %s820_s0 = inlined_call_operand.vmem [shape: s32[2,8,1], index: 0, kind: input, shape index: {}]   ;;  %s821_s1 = inlined_call_operand.hbm [shape: f32[2,16,128], index: 1, kind: input, shape index: {}]   ;;  %s822_s2 = inlined_call_operand.hbm [shape: f32[2,8,128], index: 2, kind: output, shape index: {}]  }
   0x1   :  { %9 = vsyncpa [#allocation4 + $0x1], 0 }
   0x2   :  { %10 = vsyncpa [#allocation5], 0 }
   0x3   :  { %12 = vsyncpa [#allocation5 + $0x1], 0  ;;  %s641_s9 = smov 0   ;;  %s643_s10 = smov 0  }
   0x4   :  { %s645_s11 = smov 0   ;;  %s647_s12 = smov 0  }
   0x5   :  { %s649_s13 = smov 0   ;;  %s651_s14 = smov 0  }
   0x6 LB: > { %s404_s15 = sadd.s32 4294967295, %s616_s14   ;;  %s405_s16 = sadd.s32 4294967294, %s616_s14   ;;  %s616_s14 = sphi %s651_s14, %s18_s14   ;;  %s612_s13 = sphi %s649_s13, %s837_s13   ;;  %s608_s12 = sphi %s647_s12, %s836_s12   ;;  %s604_s11 = sphi %s645_s11, %s835_s11   ;;  %s600_s10 = sphi %s643_s10, %s834_s10   ;;  %s596_s9 = sphi %s641_s9, %s833_s9  }
   0x7   : > { %s30_s17 = sadd.s32 1, %s612_s13  ;;  %s65_s18 = sadd.s32 1, %s604_s11 }
   0x8   : > { %p32_p0 = scmp.ge.s32.totalorder %s30_s17, 2  ;;  %p72_p1 = scmp.ne.s32.totalorder %s604_s11, %s600_s10 }
   0x9   : > { %p73_p2 = scmp.eq.s32.totalorder %s616_s14, 0  ;;  %p78_p3 = scmp.ne.s32.totalorder %s600_s10, %s596_s9 }
   0xa   : > { %s839_s17 = smov (%p32_p0, %s30_s17), 0  ;;  %p79_p5 = scmp.eq.s32.totalorder %s404_s15, 0 }
   0xb   : > { %p682_p4 = por %p73_p2, %p72_p1  ;;  %s60_s20 = ssub.s32 %s612_s13, %s839_s17 }
   0xc   : > { %p102_p6 = scmp.eq.s32.totalorder %s404_s15, 1  ;;  %p63_p7 = scmp.eq.s32.totalorder %s60_s20, 0 }
   0xd   : > { %p688_p8 = por %p79_p5, %p78_p3  ;;  %p108_p10 = scmp.eq.s32.totalorder %s405_s16, 1 }
   0xe   : > { %p692_p9 = por %p102_p6, %p72_p1  ;;  %p447_p13 = scmp.lt.s32.totalorder %s616_s14, 2 }
   0xf   : > { %s697_s23 = scalar_select %p63_p7, %s604_s11, %s65_s18  }
  0x10   : > { %s826_s22 = scalar_select %p692_p9, 1, 0 }
  0x11   : > { %p699_p11 = por %p108_p10, %p78_p3  ;;  %s135_s25 = sand.u32 1, %s604_s11  }
  0x12   : > { %s408_s26 = sshll.u32 %s135_s25, 4  ;;  %s421_s27 = sshll.u32 %s612_s13, 8 }
  0x13   : > { %s827_s24 = scalar_select %p699_p11, 1, 0 }
  0x14   : > { %s710_s30 = scalar_lea.hbm %s821_s1, %s421_s27  ;;  %s139_s3 = scalar_lea.vmem [#allocation3], %s408_s26 }
  0x15   : > { %s148_s4 = sshll.u32 %s139_s3, 4  ;;  %p716_p0 = pnand %p447_p13, %p682_p4  ;;  %s712_s4 = int_to_ptr.vmem [resolvable:$true] %s148_s4 }
  0x16   : > { %s721_s6 = scalar_lea.sflag [#allocation4], %s135_s25  ;;  %s504_s7 = scalar_lea.hbm %s710_s30, 256 }
  0x17   : > { %p505_p2 = scmp.ne.s32.totalorder %s710_s30, %s504_s7  ;;  %p506_p3 = pneg %p716_p0 }
  0x18   : > { %s509_s16 = scalar_lea.hbm %s821_s1, 512  ;;  %p510_p4 = scmp.lt.u32.totalorder %s710_s30, %s821_s1 }
  0x19   : > { %p507_p5 = pnand %p506_p3, %p505_p2  ;;  %p511_p7 = scmp.lt.u32.totalorder %s509_s16, %s504_s7 }
  0x1a   : > { %p513_p13 = scmp.lt.u32.totalorder %s504_s7, %s710_s30 }
  0x1b   : > { %p508_p6 = pneg %p507_p5  ;;  %p512_p10 = por %p511_p7, %p510_p4 }
  0x1d   : > { %p514_p12 = por %p513_p13, %p512_p10 }
  0x1f   : > { %p515_p1 = pnand %p514_p12, %p508_p6 }
  0x21   : > { %518 = shalt.err (!%p515_p1)
}
  0x22   : > { %s519_s20 = scalar_lea.vmem %s712_s4, 256  ;;  %s618_s25 = smov [#allocation3]  }
  0x23   : > { %p520_p2 = scmp.ne.s32.totalorder %s712_s4, %s519_s20  ;;  %s524_s26 = sshll.u32 %s618_s25, 4  ;;  %s525_s26 = int_to_ptr.vmem [resolvable:$false] %s524_s26 }
  0x24   : > { %s526_s27 = scalar_lea.vmem %s525_s26, 512  ;;  %p527_p9 = scmp.lt.s32.totalorder %s712_s4, %s525_s26 }
  0x25   : > { %p522_p5 = pnand %p520_p2, %p506_p3  ;;  %p528_p4 = scmp.lt.s32.totalorder %s526_s27, %s519_s20 }
  0x27   : > { %p523_p11 = pneg %p522_p5  ;;  %p529_p7 = por %p528_p4, %p527_p9 }
  0x29   : > { %p530_p10 = pnand %p529_p7, %p523_p11 }
  0x2b   : > { %533 = shalt.err (!%p530_p10)
}
  0x2c   : > { %s619_s28 = smov 128   ;;  %s620_s29 = smov 8  }
  0x2d   : > { %442 = dma.hbm_to_vmem [thread:$0]  (!%p716_p0), %s710_s30, 256, %s712_s4, %s721_s6, %s619_s28, %s619_s28, %s620_s29  }
  0x2e   : > { %p156_p12 = scmp.lt.s32.totalorder %s616_s14, 3  ;;  %p829_p1 = scmp.ge.s32.totalorder %s616_s14, 1 }
  0x30   : > { %p157_p3 = pnand %p829_p1, %p156_p12 }
  0x31   : > { %s753_s3 = sand.u32 (!%p157_p3), 1, %s600_s10  }
  0x32   : > { %160 = sbr.rel (%p157_p3) target bundleno = 421 (0x1a5), region = 28  ;;  %s412_s7 = sshll.u32 (!%p157_p3), %s753_s3, 4 }
  0x33   : > { %s163_s8 = scalar_lea.sflag (!%p157_p3), [#allocation4], %s753_s3  ;;  %s166_s15 = scalar_lea.vmem (!%p157_p3), [#allocation3], %s412_s7 }
  0x39   : > { %587 = dma.done.wait (%p688_p8), %s163_s8, 256  }
  0x3a   : > { %589 = vsyncadd (%p688_p8), %s163_s8, 4294967040  ;;  %p191_p9 = scmp.lt.s32.totalorder %s608_s12, 1  ;;  %v621_v0 = vmov 0   ;;  %v622_v1 = vmov 0.0|0.0   ;;  %v213_v3 = vld [vmem:[%s166_s15] sm:$0xff]  ;;  %v214_v4 = vld [vmem:[%s166_s15 + $0x8] sm:$0xff]  ;;  %v203_v7 = vlaneseq }
  0x3b   : > { %503 = vset.pattern.permute.xlu0 %v621_v0  ;;  %432 = vmatprep.subr.bf16.mxu0 %v622_v1  ;;  %v433_v5 = vpack.c.bf16 %v214_v4, %v213_v3  ;;  %vm623_vm0 = vmmov 0   ;;  %v624_v6 = vmov 0.0   ;;  %vm216_vm1 = vcmask 130048   ;;  %s413_s21 = sshll.u32 %s753_s3, 3  ;;  %s418_s20 = sshll.u32 %s608_s12, 7 }
  0x3c   : > { %s192_s30 = scalar_select %p191_p9, %s608_s12, 1  ;;  %429 = vmatprep.mubr.msk.f32.mxu0 %vm623_vm0, %v624_v6  ;;  %v204_v8 = vand.u32 127, %v203_v7 }
  0x3d   : > { %434 = vmatpush3.bf16.msra.mxu0 %v433_v5  ;;  %s190_s18 = scalar_lea.vmem [#allocation6], %s413_s21  ;;  %s773_s27 = scalar_lea.hbm %s822_s2, %s418_s20 }
  0x3e   : > { %s414_s4 = sshll.u32 %s192_s30, 3  ;;  %s311_s19 = sshll.u32 %s190_s18, 4  ;;  %s768_s19 = int_to_ptr.vmem [resolvable:$true] %s311_s19 }
  0x3f   : > { %s194_s16 = scalar_lea.vmem %s820_s0, %s414_s4  ;;  %s298_s28 = scalar_lea.sflag [#allocation5], %s753_s3 }
  0x40   : > { %v202_v2 = vld [vmem:[%s194_s16] sm:$0xff]  ;;  %s534_s29 = scalar_lea.vmem %s768_s19, 128  ;;  %p830_p11 = scmp.ne.s32.totalorder %s826_s22, 0 }
  0x41   : > { %208 = vperm.xlu0 %503, %v202_v2   ;;  %p535_p8 = scmp.ne.s32.totalorder %s768_s19, %s534_s29  ;;  %s625_s12 = smov [#allocation6]  }
  0x42   : > { %s538_s7 = sshll.u32 %s625_s12, 4  ;;  %s539_s7 = int_to_ptr.vmem [resolvable:$false] %s538_s7 }
  0x43   : > { %p536_p0 = pnand %p535_p8, %p830_p11  ;;  %s540_s8 = scalar_lea.vmem %s539_s7, 256 }
  0x44   : > { %p541_p13 = scmp.lt.s32.totalorder %s768_s19, %s539_s7  ;;  %p542_p2 = scmp.lt.s32.totalorder %s540_s8, %s534_s29 }
  0x45   : > { %p537_p6 = pneg %p536_p0 }
  0x46   : > { %p543_p5 = por %p542_p2, %p541_p13 }
  0x48   : > { %p544_p4 = pnand %p543_p5, %p537_p6 }
  0xc0   : > { %v209_v9 = vpop.permute.xlu0 %208 }
  0xc1   : > { %vm210_vm2 = vcmp.eq.s32.totalorder %v209_v9, %v204_v8 }
  0xc2   : > { %v415_v10 = vsel %vm210_vm2, 1.0, %v624_v6 }
  0xc3   : > { %430 = vmatmul.mubr.msk.f32.vlgmr.msra.gmra.mrb[0].mxu0 %vm216_vm1, %v415_v10 }
 0x196   : > { %v286_v11 = vpop.f32.mrb[0].mxu0 }
 0x197   : > { %296 = vst [vmem:[%s190_s18] sm:$0xff] %v286_v11  ;;  %v431_v12 = vpop.f32.mrb[1].mxu0 }
 0x198   : > { %547 = shalt.err (!%p544_p4)
}
 0x199   : > { %s548_s3 = scalar_lea.hbm %s773_s27, 128  ;;  %s552_s4 = scalar_lea.hbm %s822_s2, 256 }
 0x19a   : > { %p549_p7 = scmp.ne.s32.totalorder %s773_s27, %s548_s3  ;;  %p553_p1 = scmp.lt.u32.totalorder %s773_s27, %s822_s2 }
 0x19b   : > { %p554_p3 = scmp.lt.u32.totalorder %s552_s4, %s548_s3  ;;  %p556_p8 = scmp.lt.u32.totalorder %s548_s3, %s773_s27 }
 0x19c   : > { %p550_p10 = pnand %p549_p7, %p830_p11 }
 0x19d   : > { %p555_p9 = por %p554_p3, %p553_p1 }
 0x19e   : > { %p551_p12 = pneg %p550_p10 }
 0x19f   : > { %p557_p0 = por %p556_p8, %p555_p9 }
 0x1a1   : > { %p558_p6 = pnand %p557_p0, %p551_p12 }
 0x1a3   : > { %561 = shalt.err (!%p558_p6)
}
 0x1a4   : > { %437 = dma.vmem_to_hbm [thread:$0]  (%p830_p11), %s768_s19, 128, %s773_s27, %s298_s28  }
 0x1a5 PF: > { %s323_s16 = sand.u32 1, %s596_s9   ;;  %p831_p13 = scmp.ne.s32.totalorder %s827_s24, 0 }
 0x1a6   : > { %p832_p2 = scmp.ge.s32.totalorder %s616_s14, 2  ;;  %s324_s21 = scalar_lea.sflag [#allocation5], %s323_s16 }
 0x1a8   : > { %p444_p5 = pnand %p832_p2, %p831_p13 }
 0x1aa   : > { %591 = dma.done.wait (!%p444_p5), %s324_s21, 128  }
 0x1ab   : > { %593 = vsyncadd (!%p444_p5), %s324_s21, 4294967168  ;;  %s18_s14 = sadd.s32 1, %s616_s14   ;;  %s833_s9 = smov %s600_s10 }
 0x1ac   : > { %p15_p4 = scmp.ge.s32.totalorder %s18_s14, 4   ;;  %s834_s10 = smov %s604_s11 }
 0x1ad   : > { %s835_s11 = smov %s697_s23  ;;  %s836_s12 = smov %s612_s13 }
 0x1ae   : > { %s837_s13 = smov %s839_s17  ;;  %17 = sbr.rel (!%p15_p4) target bundleno = 6 (0x6), region = 84 }
 0x1b5   :  { %329 = vsyncpa [#allocation4], 1 }
 0x1b6   :  { %331 = vsyncpa [#allocation4 + $0x1], 1 }
 0x1b7   :  { %332 = vsyncpa [#allocation5], 1 }
 0x1b8   :  { %334 = vsyncpa [#allocation5 + $0x1], 1 }

</bundles_post_ra>
